<compile_context>
chip_gen: v6e
topology: v6e:2x2x1
jax: 0.10.0
libtpu: 0.0.40
codegen_flags: <defaults>
</compile_context>

<pallas_src>
import numpy as np
import jax
import jax.numpy as jnp
from jax.experimental import pallas as pl
from jax.experimental.pallas import tpu as pltpu


# ----------------------------------------------------------------------------
# Pallas kernel: one grid point per time block.  Body = two MXU matmuls plus
# the trend/sinusoid basis written into VMEM scratch.
# ----------------------------------------------------------------------------
def emd_hybrid_kernel(time_ref, emd_ref, weff_ref, coeff_ref, omega_ref,
                      out_ref, basis_ref):
    t = time_ref[...]                                            # (1, T_TILE)

    # EMD seasonal term with the sigmoid spatial mix folded into W_eff
    # (precomputed in the wrapper): (1-m)*x + m*(W@x) == W_eff @ x.
    acc = jnp.dot(weff_ref[...], emd_ref[...],
                  preferred_element_type=jnp.float32)            # (N, T_TILE)

    # (8, T_TILE) basis = [1, t, sin(w_i t), cos(w_i t)], built by row writes
    # into VMEM scratch (no lane-narrow concatenate / relayouts).
    wt0 = omega_ref[0] * t
    wt1 = omega_ref[1] * t
    wt2 = omega_ref[2] * t
    basis_ref[0:1, :] = jnp.ones_like(t)
    basis_ref[1:2, :] = t
    basis_ref[2:3, :] = jnp.sin(wt0)
    basis_ref[3:4, :] = jnp.sin(wt1)
    basis_ref[4:5, :] = jnp.sin(wt2)
    basis_ref[5:6, :] = jnp.cos(wt0)
    basis_ref[6:7, :] = jnp.cos(wt1)
    basis_ref[7:8, :] = jnp.cos(wt2)

    # offset + trend*t + sum_i amp_s_i*sin(w_i t + th_i), using
    # a*sin(wt+th) = (a*cos th)*sin(wt) + (a*sin th)*cos(wt), as one
    # (N,8)@(8,T_TILE) matmul.
    out_ref[...] = acc + jnp.dot(coeff_ref[...], basis_ref[...],
                                 preferred_element_type=jnp.float32)


# ----------------------------------------------------------------------------
# Tile-size heuristic: biggest time block (<=2048, multiple of 128) whose
# double-buffered streams fit a conservative VMEM budget; keep >=2 blocks when
# T allows so both v7x TensorCores get balanced work.
# ----------------------------------------------------------------------------
def _choose_t_tile(n, T, vmem_budget_bytes=24 << 20):
    fixed = 4 * (n * n + 2 * n * 128)            # W_eff (1x) + coeff (padded, 2x)
    per_col = 4 * (2 * n + 2 * n + 2 * 1 + 8)    # emd(2x) + out(2x) + time(2x) + basis
    avail = max(vmem_budget_bytes - fixed, 4 << 20)
    t_tile = int((avail // per_col) // 128 * 128)
    t_tile = max(128, min(2048, t_tile))
    if T > 128:                                   # prefer >= 2 blocks (megacore)
        t_half = ((T + 1) // 2 + 127) // 128 * 128
        t_tile = min(t_tile, t_half)
    return max(128, t_tile)


# ----------------------------------------------------------------------------
# Wrapper: hoists all time-independent work, pads T, launches the grid.
# ----------------------------------------------------------------------------
def emd_hybrid_forward(time_vector, constant_offset, linear_trend,
                       emd_seasonal_components, neighbor_W,
                       emd_spatial_weights, residual_amplitudes,
                       residual_phases, residual_periods, *, t_tile=None):
    n = constant_offset.shape[0]
    T = time_vector.shape[0]
    if t_tile is None:
        t_tile = _choose_t_tile(n, T)
    assert t_tile % 128 == 0
    T_pad = -(-T // t_tile) * t_tile
    n_blocks = T_pad // t_tile

    f32 = jnp.float32
    w = neighbor_W.astype(f32)

    # --- time-independent preprocessing (tiny XLA ops, once per forward) ----
    # Pre-summed EMD seasonal signal (constant buffer in the module).
    emd_sum = jnp.sum(emd_seasonal_components.astype(f32), axis=1)            # (N, T)

    # Sigmoid spatial mix folded into the neighbor matrix.
    mix = jax.nn.sigmoid(emd_spatial_weights.astype(f32)).reshape(n, 1)       # (N, 1)
    w_eff = mix * w + (1.0 - mix) * jnp.eye(n, dtype=f32)                     # (N, N)

    # Spatial smoothing of residual amplitudes / phases (sf = 0.15 constant),
    # phases smoothed as unit phasors then renormalized (== arctan2 path).
    sf = 0.15
    amp = residual_amplitudes.astype(f32)
    ph = residual_phases.astype(f32)
    amp_s = (1.0 - sf) * amp + sf * (w @ amp)                                  # (N, 3)
    cp, sp = jnp.cos(ph), jnp.sin(ph)
    re = (1.0 - sf) * cp + sf * (w @ cp)
    im = (1.0 - sf) * sp + sf * (w @ sp)
    inv_r = jax.lax.rsqrt(re * re + im * im + 1e-12)
    coeff = jnp.concatenate(
        [constant_offset.astype(f32).reshape(n, 1),
         linear_trend.astype(f32).reshape(n, 1),
         amp_s * (re * inv_r),
         amp_s * (im * inv_r)], axis=1)                                        # (N, 8)

    omega = (2.0 * np.pi / residual_periods.astype(f32)).astype(f32)          # (3,)

    # Pad the time axis up to a multiple of t_tile (zeros; sliced off below).
    tv = time_vector.astype(f32).reshape(1, T)
    if T_pad != T:
        tv = jnp.pad(tv, ((0, 0), (0, T_pad - T)))
        emd_sum = jnp.pad(emd_sum, ((0, 0), (0, T_pad - T)))

    # --- VMEM budget / cost hints -------------------------------------------
    vmem_bytes = 4 * (4 * n * t_tile        # emd + out, double-buffered
                      + 16 * t_tile         # time (padded sublane), 2 buffers
                      + n * n               # W_eff (single-buffered)
                      + 2 * n * 128         # coeff, lane-padded, 2 buffers
                      + 8 * t_tile)         # basis scratch
    vmem_limit = int(min(64 << 20, max(32 << 20, 2 * vmem_bytes)))

    flops = n_blocks * (2 * n * n * t_tile + 2 * n * 8 * t_tile + n * t_tile)
    transcendentals = n_blocks * 6 * t_tile
    bytes_accessed = 4 * (2 * n * T_pad + T_pad + n * n + n * 8 + 3)

    # Constant-index (N,N) input: single-buffer it to save VMEM.
    try:
        weff_spec = pl.BlockSpec((n, n), lambda j: (0, 0),
                                 pipeline_mode=pl.Buffered(1))
    except TypeError:
        weff_spec = pl.BlockSpec((n, n), lambda j: (0, 0))

    out = pl.pallas_call(
        emd_hybrid_kernel,
        out_shape=jax.ShapeDtypeStruct((n, T_pad), f32),
        grid=(n_blocks,),
        in_specs=[
            pl.BlockSpec((1, t_tile), lambda j: (0, j)),        # time block
            pl.BlockSpec((n, t_tile), lambda j: (0, j)),        # pre-summed EMD block
            weff_spec,                                          # W_eff (constant)
            pl.BlockSpec((n, 8), lambda j: (0, 0)),             # coeff (constant)
            pl.BlockSpec(memory_space=pltpu.MemorySpace.SMEM),  # omega (3,) scalars
        ],
        out_specs=pl.BlockSpec((n, t_tile), lambda j: (0, j)),
        scratch_shapes=[pltpu.VMEM((8, t_tile), f32)],          # basis rows
        compiler_params=pltpu.CompilerParams(
            dimension_semantics=("parallel",),                  # v7x: both TCs
            vmem_limit_bytes=vmem_limit),
        cost_estimate=pl.CostEstimate(flops=flops,
                                      transcendentals=transcendentals,
                                      bytes_accessed=bytes_accessed),
    )(tv, emd_sum, w_eff, coeff, omega)

    return out[:, :T] if T_pad != T else out


# ----------------------------------------------------------------------------
# Host-side neighbor graph (matches the module's _build_neighbor_graph,
# densified into an (N, N) row-stochastic weight matrix with zero diagonal).
# ----------------------------------------------------------------------------
def build_dense_neighbor_weights(coords, n_neighbors):
    n = coords.shape[0]
    d2 = np.sum((coords[:, None, :] - coords[None, :, :]) ** 2, axis=-1)
    np.fill_diagonal(d2, np.inf)                          # exclude self (indices[:, 1:])
    idx = np.argsort(d2, axis=1)[:, :n_neighbors]
    dist = np.sqrt(np.take_along_axis(d2, idx, axis=1))
    w = np.exp(-dist / np.mean(dist))
    w = w / (np.sum(w, axis=1, keepdims=True) + 1e-6)
    W = np.zeros((n, n), dtype=np.float32)
    W[np.repeat(np.arange(n), n_neighbors), idx.reshape(-1)] = w.reshape(-1)
    return W


# Pure-JAX reference of the module's forward pass (for correctness check).
def reference_forward(t, off, trend, emd, W, mixw, amp, phase, periods):
    tt = t[None, :]
    signals = off[:, None] + trend[:, None] * tt
    emd_sig = jnp.sum(emd, axis=1)
    mix = jax.nn.sigmoid(mixw)[:, None]
    signals = signals + (1 - mix) * emd_sig + mix * (W @ emd_sig)
    sf = 0.15
    amp_s = (1 - sf) * amp + sf * (W @ amp)
    cp, sp = jnp.cos(phase), jnp.sin(phase)
    re = (1 - sf) * cp + sf * (W @ cp)
    im = (1 - sf) * sp + sf * (W @ sp)
    th = jnp.arctan2(im, re)
    res = jnp.zeros_like(signals)
    for i in range(3):
        om = 2 * np.pi / periods[i]
        res = res + amp_s[:, i:i + 1] * jnp.sin(om * tt + th[:, i:i + 1])
    return signals + res


if __name__ == "__main__":
    # Small, TPU-friendly synthetic problem (2 time blocks exercise the grid).
    N_STATIONS = 64        # stations (sublane axis)
    N_TIME = 256           # timepoints (lane axis) -> t_tile=128, grid (2,)
    N_NEIGHBORS = 8

    key = jax.random.PRNGKey(0)
    k_coord, k_rate, k_phase, k_emd_a, k_emd_p = jax.random.split(key, 5)

    # __init__ inputs / buffers (deterministic synthetic data)
    coordinates = np.asarray(jax.random.uniform(k_coord, (N_STATIONS, 2)) * 100.0)
    linear_trend = jax.random.normal(k_rate, (N_STATIONS,)) * 2.0           # ps00_rates
    neighbor_W = jnp.asarray(build_dense_neighbor_weights(coordinates, N_NEIGHBORS))

    # Synthetic EMD seasonal components (N, 4, T).
    # TODO(synk): the IMF autocorrelation/peak-finding selection of
    # _extract_emd_seasonal_components is host-side __init__ preprocessing and
    # is not part of the forward hot path; it is stubbed with synthetic IMFs.
    time_vector = jnp.arange(N_TIME, dtype=jnp.float32) * 0.25
    band_periods = jnp.asarray([8.0, 16.0, 32.0, 64.0])
    emd_amp = jax.random.uniform(k_emd_a, (N_STATIONS, 4)) * 5.0
    emd_ph = jax.random.uniform(k_emd_p, (N_STATIONS, 4)) * 2.0 * np.pi
    emd_seasonal_components = (
        emd_amp[:, :, None]
        * jnp.sin(2.0 * np.pi / band_periods[None, :, None] * time_vector[None, None, :]
                  + emd_ph[:, :, None])
    ).astype(jnp.float32)

    # nn.Parameters, initialized exactly as in __init__
    constant_offset = jnp.zeros((N_STATIONS,), jnp.float32)
    residual_amplitudes = jnp.ones((N_STATIONS, 3), jnp.float32) * 2.0
    residual_phases = jax.random.uniform(k_phase, (N_STATIONS, 3)) * 2.0 * np.pi
    residual_periods = jnp.asarray([30.0, 45.0, 180.0], jnp.float32)
    emd_spatial_weights = jnp.ones((N_STATIONS,), jnp.float32) * 0.1

    out = emd_hybrid_forward(time_vector, constant_offset, linear_trend,
                             emd_seasonal_components, neighbor_W,
                             emd_spatial_weights, residual_amplitudes,
                             residual_phases, residual_periods)
    out = jax.block_until_ready(out)

    ref = reference_forward(time_vector, constant_offset, linear_trend,
                            emd_seasonal_components, neighbor_W,
                            emd_spatial_weights, residual_amplitudes,
                            residual_phases, residual_periods)
    np.testing.assert_allclose(np.asarray(out), np.asarray(ref), rtol=2e-3, atol=2e-3)

    print("KERNEL_OK")
</pallas_src>

<mosaic_0001>
module attributes {stable_mosaic.version = 11 : i64} {
  func.func @emd_hybrid_kernel(%arg0: i32, %arg1: memref<1x128xf32, #tpu.memory_space<vmem>>, %arg2: memref<64x128xf32, #tpu.memory_space<vmem>>, %arg3: memref<64x64xf32, #tpu.memory_space<vmem>>, %arg4: memref<64x8xf32, #tpu.memory_space<vmem>>, %arg5: memref<3xf32, #tpu.memory_space<smem>>, %arg6: memref<64x128xf32, #tpu.memory_space<vmem>>, %arg7: memref<8x128xf32, #tpu.memory_space<vmem>>) attributes {dimension_semantics = [#tpu.dimension_semantics<parallel>], iteration_bounds = array<i64: 2>, scalar_prefetch = 0 : i64, scratch_operands = 1 : i64, tpu.core_type = #tpu.core_type<tc>, window_params = [{transform_indices = @transform_0, window_bounds = array<i64: 1, 128>}, {transform_indices = @transform_1, window_bounds = array<i64: 64, 128>}, {pipeline_mode = #tpu.pipeline_mode<synchronous>, transform_indices = @transform_2, window_bounds = array<i64: 64, 64>}, {pipeline_mode = #tpu.pipeline_mode<synchronous>, transform_indices = @transform_3, window_bounds = array<i64: 64, 8>}, {transform_indices = @transform_4, window_bounds = array<i64: 3>}, {transform_indices = @transform_5, window_bounds = array<i64: 64, 128>}]} {
    %c0 = arith.constant 0 : index
    %c0_0 = arith.constant 0 : index
    %0 = vector.load %arg1[%c0, %c0_0] : memref<1x128xf32, #tpu.memory_space<vmem>>, vector<1x128xf32>
    %c0_1 = arith.constant 0 : index
    %c0_2 = arith.constant 0 : index
    %1 = vector.load %arg3[%c0_1, %c0_2] : memref<64x64xf32, #tpu.memory_space<vmem>>, vector<64x64xf32>
    %c0_3 = arith.constant 0 : index
    %c0_4 = arith.constant 0 : index
    %2 = vector.load %arg2[%c0_3, %c0_4] : memref<64x128xf32, #tpu.memory_space<vmem>>, vector<64x128xf32>
    %cst = arith.constant dense<0.000000e+00> : vector<64x128xf32>
    %3 = tpu.matmul %1, %2, %cst {dimension_numbers = #tpu.dot_dimension_numbers<[1], [0], [0], [1], [0, 0, 1, 1], [], []>} : vector<64x64xf32>, vector<64x128xf32>, vector<64x128xf32> -> vector<64x128xf32>
    %c0_5 = arith.constant 0 : index
    %4 = memref.load %arg5[%c0_5] : memref<3xf32, #tpu.memory_space<smem>>
    %5 = vector.broadcast %4 : f32 to vector<1x128xf32>
    %6 = arith.mulf %5, %0 : vector<1x128xf32>
    %c1 = arith.constant 1 : index
    %7 = memref.load %arg5[%c1] : memref<3xf32, #tpu.memory_space<smem>>
    %8 = vector.broadcast %7 : f32 to vector<1x128xf32>
    %9 = arith.mulf %8, %0 : vector<1x128xf32>
    %c2 = arith.constant 2 : index
    %10 = memref.load %arg5[%c2] : memref<3xf32, #tpu.memory_space<smem>>
    %11 = vector.broadcast %10 : f32 to vector<1x128xf32>
    %12 = arith.mulf %11, %0 : vector<1x128xf32>
    %cst_6 = arith.constant 1.000000e+00 : f32
    %13 = vector.broadcast %cst_6 : f32 to vector<1x128xf32>
    %c0_7 = arith.constant 0 : index
    %c0_8 = arith.constant 0 : index
    %14 = vector.load %arg7[%c0_7, %c0_8] : memref<8x128xf32, #tpu.memory_space<vmem>>, vector<1x128xf32>
    tpu.vector_store %arg7[%c0_7, %c0_8], %13 {strides = array<i32>} : memref<8x128xf32, #tpu.memory_space<vmem>>, vector<1x128xf32>,
    %c1_9 = arith.constant 1 : index
    %c0_10 = arith.constant 0 : index
    %15 = vector.load %arg7[%c1_9, %c0_10] : memref<8x128xf32, #tpu.memory_space<vmem>>, vector<1x128xf32>
    tpu.vector_store %arg7[%c1_9, %c0_10], %0 {strides = array<i32>} : memref<8x128xf32, #tpu.memory_space<vmem>>, vector<1x128xf32>,
    %16 = math.sin %6 : vector<1x128xf32>
    %c2_11 = arith.constant 2 : index
    %c0_12 = arith.constant 0 : index
    %17 = vector.load %arg7[%c2_11, %c0_12] : memref<8x128xf32, #tpu.memory_space<vmem>>, vector<1x128xf32>
    tpu.vector_store %arg7[%c2_11, %c0_12], %16 {strides = array<i32>} : memref<8x128xf32, #tpu.memory_space<vmem>>, vector<1x128xf32>,
    %18 = math.sin %9 : vector<1x128xf32>
    %c3 = arith.constant 3 : index
    %c0_13 = arith.constant 0 : index
    %19 = vector.load %arg7[%c3, %c0_13] : memref<8x128xf32, #tpu.memory_space<vmem>>, vector<1x128xf32>
    tpu.vector_store %arg7[%c3, %c0_13], %18 {strides = array<i32>} : memref<8x128xf32, #tpu.memory_space<vmem>>, vector<1x128xf32>,
    %20 = math.sin %12 : vector<1x128xf32>
    %c4 = arith.constant 4 : index
    %c0_14 = arith.constant 0 : index
    %21 = vector.load %arg7[%c4, %c0_14] : memref<8x128xf32, #tpu.memory_space<vmem>>, vector<1x128xf32>
    tpu.vector_store %arg7[%c4, %c0_14], %20 {strides = array<i32>} : memref<8x128xf32, #tpu.memory_space<vmem>>, vector<1x128xf32>,
    %22 = math.cos %6 : vector<1x128xf32>
    %c5 = arith.constant 5 : index
    %c0_15 = arith.constant 0 : index
    %23 = vector.load %arg7[%c5, %c0_15] : memref<8x128xf32, #tpu.memory_space<vmem>>, vector<1x128xf32>
    tpu.vector_store %arg7[%c5, %c0_15], %22 {strides = array<i32>} : memref<8x128xf32, #tpu.memory_space<vmem>>, vector<1x128xf32>,
    %24 = math.cos %9 : vector<1x128xf32>
    %c6 = arith.constant 6 : index
    %c0_16 = arith.constant 0 : index
    %25 = vector.load %arg7[%c6, %c0_16] : memref<8x128xf32, #tpu.memory_space<vmem>>, vector<1x128xf32>
    tpu.vector_store %arg7[%c6, %c0_16], %24 {strides = array<i32>} : memref<8x128xf32, #tpu.memory_space<vmem>>, vector<1x128xf32>,
    %26 = math.cos %12 : vector<1x128xf32>
    %c7 = arith.constant 7 : index
    %c0_17 = arith.constant 0 : index
    %27 = vector.load %arg7[%c7, %c0_17] : memref<8x128xf32, #tpu.memory_space<vmem>>, vector<1x128xf32>
    tpu.vector_store %arg7[%c7, %c0_17], %26 {strides = array<i32>} : memref<8x128xf32, #tpu.memory_space<vmem>>, vector<1x128xf32>,
    %c0_18 = arith.constant 0 : index
    %c0_19 = arith.constant 0 : index
    %28 = vector.load %arg4[%c0_18, %c0_19] : memref<64x8xf32, #tpu.memory_space<vmem>>, vector<64x8xf32>
    %c0_20 = arith.constant 0 : index
    %c0_21 = arith.constant 0 : index
    %29 = vector.load %arg7[%c0_20, %c0_21] : memref<8x128xf32, #tpu.memory_space<vmem>>, vector<8x128xf32>
    %cst_22 = arith.constant dense<0.000000e+00> : vector<64x128xf32>
    %30 = tpu.matmul %28, %29, %cst_22 {dimension_numbers = #tpu.dot_dimension_numbers<[1], [0], [0], [1], [0, 0, 1, 1], [], []>} : vector<64x8xf32>, vector<8x128xf32>, vector<64x128xf32> -> vector<64x128xf32>
    %31 = arith.addf %3, %30 : vector<64x128xf32>
    %c0_23 = arith.constant 0 : index
    %c0_24 = arith.constant 0 : index
    %32 = vector.load %arg6[%c0_23, %c0_24] : memref<64x128xf32, #tpu.memory_space<vmem>>, vector<64x128xf32>
    tpu.vector_store %arg6[%c0_23, %c0_24], %31 {strides = array<i32>} : memref<64x128xf32, #tpu.memory_space<vmem>>, vector<64x128xf32>,
    return
  }
  func.func @transform_0(%arg0: i32) -> (i32, i32) {
    %c0_i32 = arith.constant 0 : i32
    %c0_i32_0 = arith.constant 0 : i32
    return %c0_i32, %arg0 : i32, i32
  }
  func.func @transform_1(%arg0: i32) -> (i32, i32) {
    %c0_i32 = arith.constant 0 : i32
    %c0_i32_0 = arith.constant 0 : i32
    return %c0_i32, %arg0 : i32, i32
  }
  func.func @transform_2(%arg0: i32) -> (i32, i32) {
    %c0_i32 = arith.constant 0 : i32
    %c0_i32_0 = arith.constant 0 : i32
    %c0_i32_1 = arith.constant 0 : i32
    return %c0_i32, %c0_i32_0 : i32, i32
  }
  func.func @transform_3(%arg0: i32) -> (i32, i32) {
    %c0_i32 = arith.constant 0 : i32
    %c0_i32_0 = arith.constant 0 : i32
    %c0_i32_1 = arith.constant 0 : i32
    return %c0_i32, %c0_i32_0 : i32, i32
  }
  func.func @transform_4(%arg0: i32) -> i32 {
    %c0_i32 = arith.constant 0 : i32
    %c0_i32_0 = arith.constant 0 : i32
    return %c0_i32 : i32
  }
  func.func @transform_5(%arg0: i32) -> (i32, i32) {
    %c0_i32 = arith.constant 0 : i32
    %c0_i32_0 = arith.constant 0 : i32
    return %c0_i32, %arg0 : i32, i32
  }
}

</mosaic_0001>

<bundles_post_ra>
// kernel: tpu_custom_call.1
= control target key start
LH: loop header
LB: loop body
LE: loop exit
PB: predicated region body
PF: predicated region fallthrough
CT: control target
= control target key end

     0   :  { %10 = vsyncpa [#allocation4], 0  ;;  %s2189_s0 = inlined_call_operand.vmem [shape: f32[1,256], index: 0, kind: input, shape index: {}]   ;;  %s2190_s1 = inlined_call_operand.hbm [shape: f32[64,256], index: 1, kind: input, shape index: {}]   ;;  %s2191_s2 = inlined_call_operand.vmem [shape: f32[64,64], index: 2, kind: input, shape index: {}]   ;;  %s2192_s3 = inlined_call_operand.vmem [shape: f32[64,8], index: 3, kind: input, shape index: {}]   ;;  %s2193_s4 = inlined_call_operand.vmem [shape: f32[3], index: 4, kind: input, shape index: {}]   ;;  %s2194_s5 = inlined_call_operand.hbm [shape: f32[64,256], index: 5, kind: output, shape index: {}]  }
   0x1   :  { %12 = vsyncpa [#allocation4 + $0x1], 0 }
   0x2   :  { %13 = vsyncpa [#allocation6], 0 }
   0x3   :  { %14 = vsyncpa [#allocation5], 0 }
   0x4   :  { %16 = vsyncpa [#allocation5 + $0x1], 0  ;;  %s1701_s18 = smov 0   ;;  %s1703_s19 = smov 0  }
   0x5   :  { %s1705_s20 = smov 0   ;;  %s1707_s21 = smov 0  }
   0x6 LB: > { %s1722_s22 = sadd.s32 4294967295, %s1653_s21   ;;  %s1309_s23 = sadd.s32 4294967294, %s1653_s21   ;;  %s1653_s21 = sphi %s1707_s21, %s2218_s21   ;;  %s1649_s20 = sphi %s1705_s20, %s2217_s20   ;;  %s1645_s19 = sphi %s1703_s19, %s2216_s19   ;;  %s1641_s18 = sphi %s1701_s18, %s2215_s18  }
   0x7   : > { %s1726_s24 = sadd.s32 1, %s1653_s21   ;;  %s55_s25 = sadd.s32 1, %s1649_s20 }
   0x8   : > { %s52_s26 = ssub.s32 %s1653_s21, %s1726_s24  ;;  %p62_p0 = scmp.ne.s32.totalorder %s1649_s20, %s1645_s19 }
   0x9   : > { %p53_p1 = scmp.eq.s32.totalorder %s52_s26, 0  ;;  %p63_p2 = scmp.eq.s32.totalorder %s1653_s21, 0 }
   0xa   : > { %p68_p3 = scmp.ne.s32.totalorder %s1645_s19, %s1641_s18  ;;  %p2196_p4 = scmp.eq.s32.totalorder %s1722_s22, 0 }
   0xb   : > { %s1738_s27 = scalar_select %p53_p1, %s1649_s20, %s55_s25  }
   0xc   : > { %p1740_p5 = por %p63_p2, %p62_p0  ;;  %p1746_p6 = por %p2196_p4, %p68_p3 }
   0xd   : > { %p155_p7 = scmp.eq.s32.totalorder %s1722_s22, 1  ;;  %p161_p8 = scmp.eq.s32.totalorder %s1309_s23, 1 }
   0xe   : > { %s2200_s29 = scalar_select %p1746_p6, 1, 0 }
   0xf   : > { %p1310_p9 = scmp.ge.s32.totalorder %s1653_s21, 1  ;;  %p168_p10 = scmp.lt.s32.totalorder %s1653_s21, 3 }
  0x10   : > { %p1753_p11 = por %p155_p7, %p62_p0  ;;  %p1757_p12 = por %p161_p8, %p68_p3 }
  0x11   : > { %p1761_p13 = pnand %p1310_p9, %p168_p10  ;;  %s187_s10 = sshll.u32 %s2193_s4, 4  ;;  %s188_s10 = int_to_ptr.vmem [resolvable:$true] %s187_s10 }
  0x12   : > { %s2201_s30 = scalar_select %p1753_p11, 1, 0 }
  0x13   : > { %s2202_s6 = scalar_select %p1757_p12, 1, 0 }
  0x14   : > { %s2203_s7 = scalar_select %p1761_p13, 1, 0 }
  0x15   : > { %p1468_p1 = pneg %p1761_p13  ;;  %p1481_p2 = scmp.lt.s32.totalorder %s1653_s21, 2 }
  0x16   : > { %s204_s12 = sand.u32 1, %s1649_s20   ;;  %s1542_s15 = scalar_lea.vmem %s188_s10, 16 }
  0x17   : > { %p1774_p7 = pnand %p1468_p1, %p2196_p4  ;;  %p1781_p3 = pnand %p1481_p2, %p1740_p5 }
  0x18   : > { %s1313_s14 = sshll.u32 %s204_s12, 6  ;;  %p1543_p8 = scmp.ne.s32.totalorder %s188_s10, %s1542_s15 }
  0x19   : > { %p1544_p9 = pneg %p1774_p7  ;;  %p1550_p12 = scmp.lt.s32.totalorder %s188_s10, %s188_s10 }
  0x1a   : > { %p1551_p11 = scmp.lt.s32.totalorder %s1542_s15, %s1542_s15 }
  0x1b   : > { %p1545_p10 = pnand %p1544_p9, %p1543_p8 }
  0x1c   : > { %p1552_p1 = por %p1551_p11, %p1550_p12 }
  0x1d   : > { %p1546_p0 = pneg %p1545_p10 }
  0x1f   : > { %p1553_p4 = pnand %p1552_p1, %p1546_p0 }
  0x21   : > { %1556 = shalt.err (!%p1553_p4)
}
  0x22   : > { %s1655_s16 = smov [#allocation7]   ;;  %s1314_s17 = sshll.u32 %s1653_s21, 7 }
  0x23   : > { %1471 = dma.vmem_to_smem (!%p1774_p7), %s188_s10, 16, %s1655_s16, [#allocation6]  }
  0x24   : > { %s208_s23 = scalar_lea.vmem [#allocation3], %s1313_s14  ;;  %s1793_s8 = scalar_lea.hbm %s2190_s1, %s1314_s17 }
  0x25   : > { %s214_s25 = sshll.u32 %s208_s23, 4  ;;  %s1797_s9 = scalar_lea.sflag [#allocation4], %s204_s12  ;;  %s1795_s25 = int_to_ptr.vmem [resolvable:$true] %s214_s25 }
  0x26   : > { %s1557_s15 = scalar_lea.hbm %s1793_s8, 1024  ;;  %p1559_p5 = pneg %p1781_p3 }
  0x27   : > { %p1558_p4 = scmp.ne.s32.totalorder %s1793_s8, %s1557_s15  ;;  %s1562_s14 = scalar_lea.hbm %s2190_s1, 2048 }
  0x28   : > { %p1563_p0 = scmp.lt.s32.totalorder %s1793_s8, %s2190_s1  ;;  %p1564_p2 = scmp.lt.s32.totalorder %s1562_s14, %s1557_s15 }
  0x29   : > { %p1560_p11 = pnand %p1559_p5, %p1558_p4 }
  0x2a   : > { %p1565_p7 = por %p1564_p2, %p1563_p0 }
  0x2b   : > { %p1561_p12 = pneg %p1560_p11 }
  0x2d   : > { %p1566_p8 = pnand %p1565_p7, %p1561_p12 }
  0x2f   : > { %1569 = shalt.err (!%p1566_p8)
}
  0x30   : > { %s1570_s12 = scalar_lea.vmem %s1795_s25, 1024  ;;  %s1656_s23 = smov [#allocation3]  }
  0x31   : > { %p1571_p9 = scmp.ne.s32.totalorder %s1795_s25, %s1570_s12  ;;  %s1575_s26 = sshll.u32 %s1656_s23, 4  ;;  %s1576_s26 = int_to_ptr.vmem [resolvable:$false] %s1575_s26 }
  0x32   : > { %s1577_s28 = scalar_lea.vmem %s1576_s26, 2048  ;;  %p1578_p4 = scmp.lt.s32.totalorder %s1795_s25, %s1576_s26 }
  0x33   : > { %p1573_p10 = pnand %p1571_p9, %p1559_p5  ;;  %p1579_p11 = scmp.lt.s32.totalorder %s1577_s28, %s1570_s12 }
  0x35   : > { %p1574_p1 = pneg %p1573_p10  ;;  %p1580_p6 = por %p1579_p11, %p1578_p4 }
  0x37   : > { %p1581_p13 = pnand %p1580_p6, %p1574_p1 }
  0x39   : > { %1584 = shalt.err (!%p1581_p13)
}
  0x3a   : > { %s1657_s15 = smov 256   ;;  %s1658_s10 = smov 128  }
  0x3b   : > { %s1659_s11 = smov 8   ;;  %p2206_p5 = scmp.ne.s32.totalorder %s2203_s7, 0 }
  0x3c   : > { %1475 = dma.hbm_to_vmem [thread:$0]  (!%p1781_p3), %s1793_s8, 1024, %s1795_s25, %s1797_s9, %s1657_s15, %s1658_s10, %s1659_s11  }
  0x3d   : > { %226 = sbr.rel (%p2206_p5) target bundleno = 431 (0x1af), region = 40  ;;  %s1821_s14 = sand.u32 (!%p2206_p5), 1, %s1645_s19  }
  0x3e   : > { %s1316_s16 = sshll.u32 (!%p2206_p5), %s1821_s14, 6  ;;  %s229_s17 = scalar_lea.sflag (!%p2206_p5), [#allocation4], %s1821_s14 }
  0x3f   : > { %s1827_s12 = scalar_lea.vmem (!%p2206_p5), [#allocation3], %s1316_s16  ;;  %p2207_p6 = scmp.ne.s32.totalorder (!%p2206_p5), %s2200_s29, 0 }
  0x42   : > { %1628 = dma.done.wait (%p2207_p6), %s229_s17, 1024  }
  0x43   : > { %1630 = vsyncadd (%p2207_p6), %s229_s17, 4294966272  ;;  %p2208_p13 = scmp.eq.s32.totalorder %s1722_s22, 0 }
  0x45   : > { %1632 = dma.done.wait (%p2208_p13), [#allocation6], 16   ;;  %p2209_p3 = pmov %p2208_p13 }
  0x47   : > { %1634 = vsyncadd (%p2209_p3), [#allocation6], 4294967280 }
  0x48   : > { %241 = sfence }
  0x49   : > { %v1838_v0 = vld [vmem:[%s1827_s12 + $0x38] sm:$0xff]  ;;  %v1841_v1 = vld [vmem:[%s1827_s12 + $0x30] sm:$0xff]  ;;  %p267_p12 = scmp.lt.s32.totalorder %s1722_s22, 1  ;;  %s287_s29 = sld [smem:[#allocation7]]  ;;  %v1847_v2 = vld [vmem:[%s1827_s12 + $0x28] sm:$0xff]  ;;  %v1660_v3 = vmov 1.0  }
  0x4a   : > { %1432 = vmatprep.subr.mxu1 %v1838_v0  ;;  %s1319_s7 = sld [smem:[#allocation7 + $0x1]]  ;;  %296 = vst [vmem:[#allocation2] sm:$0x1] %v1660_v3  ;;  %v1853_v4 = vld [vmem:[%s1827_s12 + $0x20] sm:$0xff]  ;;  %v1861_v6 = vld [vmem:[%s1827_s12 + $0x18] sm:$0xff]  ;;  %vm934_vm0 = vcmask 64512  }
  0x4b   : > { %1440 = vmatpush3.msra.mxu1 %v1838_v0  ;;  %s268_s13 = scalar_select %p267_p12, %s1722_s22, 1  ;;  %v925_v10 = vld [vmem:[%s2192_s3] sm:$0xff]  ;;  %v1873_v12 = vld [vmem:[%s1827_s12 + $0x10] sm:$0xff]  ;;  %v1884_v18 = vld [vmem:[%s1827_s12 + $0x8] sm:$0xff]  ;;  %vm1064_vm1 = vcmask 523264  }
  0x4c   : > { %1433 = vmatprep.subr.mxu1 %v1841_v1  ;;  %s1320_s25 = sld [smem:[#allocation7 + $0x2]]  ;;  %1392 = vmatprep.mubr.msk.f32.mxu0 %vm934_vm0, %v925_v10  ;;  %v1894_v23 = vld [vmem:[%s1827_s12] sm:$0xff]  ;;  %v273_v27 = vld [vmem:[%s2191_s2 + $0x10] sm:$0xff]  ;;  %v274_v30 = vld [vmem:[%s2191_s2 + $0x18] sm:$0xff]  ;;  %v1661_v46 = vmov 683565275  }
  0x4d   : > { %1441 = vmatpush3.msra.mxu1 %v1841_v1  ;;  %s269_s23 = scalar_lea.vmem %s2189_s0, %s268_s13  ;;  %v275_v34 = vld [vmem:[%s2191_s2 + $0x20] sm:$0xff]  ;;  %1423 = vmatprep.mubr.msk.f32.mxu1 %vm1064_vm1, %v273_v27  ;;  %v276_v40 = vld [vmem:[%s2191_s2 + $0x28] sm:$0xff]  ;;  %v277_v44 = vld [vmem:[%s2191_s2 + $0x30] sm:$0xff]  ;;  %v1662_v48 = vmov 2475754826   ;;  %s266_s11 = scalar_lea.vmem [#allocation8], %s1316_s16 }
  0x4e   : > { %1434 = vmatprep.subr.mxu1 %v1847_v2  ;;  %v270_v5 = vld [vmem:[%s269_s23] sm:$0x1]  ;;  %v1663_v50 = vmov 2131351028   ;;  %v1664_v52 = vmov 2102212464  }
  0x4f   : > { %1442 = vmatpush3.msra.mxu1 %v1847_v2  ;;  %v288_v7 = vstv %s287_s29  ;;  %297 = vst [vmem:[#allocation2 + $0x1] sm:$0x1] %v270_v5  ;;  %v1665_v54 = vmov 920167782   ;;  %v278_v61 = vld [vmem:[%s2191_s2 + $0x38] sm:$0xff]  ;;  %s1215_s17 = sshll.u32 %s266_s11, 4  ;;  %s2141_s17 = int_to_ptr.vmem [resolvable:$true] %s1215_s17 }
  0x50   : > { %1435 = vmatprep.subr.mxu1 %v1853_v4  ;;  %v1864_v8 = vmul.f32 %v288_v7, %v270_v5  ;;  %v291_v9 = vstv %s1319_s7  ;;  %v1666_v63 = vmov 1326507024   ;;  %s1362_s16 = sshll.u32 %s1722_s22, 7  ;;  %s1203_s13 = scalar_lea.sflag [#allocation5], %s1821_s14 }
  0x51   : > { %1443 = vmatpush3.msra.mxu1 %v1853_v4  ;;  %v1870_v11 = vmul.f32 %v291_v9, %v270_v5  ;;  %s2146_s7 = scalar_lea.hbm %s2194_s5, %s1362_s16  ;;  %p2212_p2 = scmp.ne.s32.totalorder %s2201_s30, 0 }
  0x52   : > { %1436 = vmatprep.subr.mxu1 %v1861_v6  ;;  %v294_v13 = vstv %s1320_s25  ;;  %v298_v14 = vand.u32 2147483647, %v1864_v8  ;;  %v301_v15 = vand.u32 2139095040, %v1864_v8  ;;  %s1585_s25 = scalar_lea.vmem %s2141_s17, 1024  ;;  %s1667_s22 = smov [#allocation8]  }
  0x53   : > { %1444 = vmatpush3.msra.mxu1 %v1861_v6  ;;  %v1880_v16 = vmul.f32 %v294_v13, %v270_v5  ;;  %v403_v17 = vand.u32 2147483647, %v1870_v11  ;;  %v406_v20 = vand.u32 2139095040, %v1870_v11  ;;  %p1586_p0 = scmp.ne.s32.totalorder %s2141_s17, %s1585_s25  ;;  %s1589_s8 = sshll.u32 %s1667_s22, 4  ;;  %s1590_s8 = int_to_ptr.vmem [resolvable:$false] %s1589_s8 }
  0x54   : > { %v302_v19 = vshrl.u32 %v301_v15, 23  ;;  %1437 = vmatprep.subr.mxu1 %v1873_v12  ;;  %v305_v21 = vand.u32 8388607, %v298_v14  ;;  %s1591_s9 = scalar_lea.vmem %s1590_s8, 2048  ;;  %p1592_p9 = scmp.lt.s32.totalorder %s2141_s17, %s1590_s8 }
  0x55   : > { %v410_v22 = vand.u32 8388607, %v403_v17  ;;  %1445 = vmatpush3.msra.mxu1 %v1873_v12  ;;  %v407_v25 = vshrl.u32 %v406_v20, 23  ;;  %v511_v26 = vand.u32 2139095040, %v1880_v16  ;;  %p1587_p7 = pnand %p1586_p0, %p2212_p2  ;;  %p1593_p10 = scmp.lt.s32.totalorder %s1591_s9, %s1585_s25 }
  0x56   : > { %v1321_v24 = vadd.s32 4294967169, %v302_v19  ;;  %1438 = vmatprep.subr.mxu1 %v1884_v18  ;;  %v306_v31 = vor.u32 8388608, %v305_v21 }
  0x57   : > { %1446 = vmatpush3.msra.mxu1 %v1884_v18  ;;  %v1325_v29 = vadd.s32 4294967169, %v407_v25  ;;  %v411_v32 = vor.u32 8388608, %v410_v22  ;;  %v512_v33 = vshrl.u32 %v511_v26, 23  ;;  %p1588_p8 = pneg %p1587_p7  ;;  %p1594_p1 = por %p1593_p10, %p1592_p9 }
  0x58   : > { %v308_v28 = vadd.s32 1, %v1321_v24  ;;  %1439 = vmatprep.subr.mxu1 %v1894_v23  ;;  %v1916_v41 = vshll.u32 %v306_v31, 8 }
  0x59   : > { %1447 = vmatpush3.msra.mxu1 %v1894_v23  ;;  %v413_v35 = vadd.s32 1, %v1325_v29  ;;  %v1329_v37 = vadd.s32 4294967169, %v512_v33  ;;  %v1918_v43 = vshll.u32 %v411_v32, 8  ;;  %p1595_p4 = pnand %p1594_p1, %p1588_p8 }
  0x5a   : > { %vm309_vm2 = vcmp.gt.s32.totalorder %v308_v28, 0  ;;  %1424 = vmatmul.mubr.msk.f32.vlgmr.msra.gmra.mxu1 %vm1064_vm1, %v274_v30 }
  0x5b   : > { %v310_v36 = vsel %vm309_vm2, %v308_v28, 0  ;;  %vm414_vm3 = vcmp.gt.s32.totalorder %v413_v35, 0  ;;  %1426 = vmatprep.mubr.msk.f32.mxu1 %vm1064_vm1, %v275_v34  ;;  %v1928_v56 = vadd.s32 1, %v1329_v37 }
  0x5c   : > { %v311_v38 = vshrl.u32 %v310_v36, 5  ;;  %v312_v39 = vand.u32 31, %v310_v36  ;;  %v415_v42 = vsel %vm414_vm3, %v413_v35, 0 }
  0x5d   : > { %v416_v15 = vshrl.u32 %v415_v42, 5  ;;  %v417_v19 = vand.u32 31, %v415_v42  ;;  %vm519_vm10 = vcmp.gt.s32.totalorder %v1928_v56, 0 }
  0x5e   : > { %v313_v45 = vsub.s32 32, %v312_v39  ;;  %v315_v47 = vshll.u32 %v1661_v46, %v312_v39  ;;  %v318_v49 = vshll.u32 %v1662_v48, %v312_v39  ;;  %v321_v51 = vshll.u32 %v1663_v50, %v312_v39  ;;  %1427 = vmatmul.mubr.msk.f32.gmra.mxu1 %vm1064_vm1, %v276_v40 }
  0x5f   : > { %v324_v53 = vshll.u32 %v1664_v52, %v312_v39  ;;  %v327_v55 = vshll.u32 %v1665_v54, %v312_v39  ;;  %vm330_vm4 = vcmp.lt.s32.totalorder %v311_v38, 1  ;;  %1429 = vmatprep.mubr.msk.f32.mxu1 %vm1064_vm1, %v277_v44  ;;  %vm331_vm5 = vcmp.lt.s32.totalorder %v311_v38, 2 }
  0x60   : > { %v314_v57 = vshrl.u32 %v1661_v46, %v313_v45  ;;  %v316_v58 = vshrl.u32 %v1662_v48, %v313_v45  ;;  %v319_v59 = vshrl.u32 %v1663_v50, %v313_v45  ;;  %v322_v60 = vshrl.u32 %v1664_v52, %v313_v45 }
  0x61   : > { %v325_v62 = vshrl.u32 %v1665_v54, %v313_v45  ;;  %v328_v3 = vshrl.u32 %v1666_v63, %v313_v45  ;;  %vm332_vm6 = vcmp.lt.s32.totalorder %v311_v38, 3  ;;  %vm333_vm7 = vcmp.lt.s32.totalorder %v311_v38, 4 }
  0x62   : > { %v317_v5 = vor.u32 %v316_v58, %v315_v47  ;;  %v320_v7 = vor.u32 %v319_v59, %v318_v49  ;;  %v323_v9 = vor.u32 %v322_v60, %v321_v51  ;;  %1430 = vmatmul.mubr.msk.f32.gmra.mxu1 %vm1064_vm1, %v278_v61  ;;  %v418_v28 = vsub.s32 32, %v417_v19 }
  0x63   : > { %v326_v10 = vor.u32 %v325_v62, %v324_v53  ;;  %v329_v13 = vor.u32 %v328_v3, %v327_v55  ;;  %v420_v32 = vshll.u32 %v1661_v46, %v417_v19  ;;  %v423_v45 = vshll.u32 %v1662_v48, %v417_v19 }
  0x64   : > { %v334_v20 = vsel %vm330_vm4, %v314_v57, %v317_v5  ;;  %v335_v21 = vsel %vm333_vm7, %v323_v9, 2102212464  ;;  %v338_v22 = vsel %vm330_vm4, %v317_v5, %v320_v7  ;;  %v342_v24 = vsel %vm330_vm4, %v320_v7, %v323_v9 }
  0x65   : > { %v336_v25 = vsel %vm332_vm6, %v320_v7, %v335_v21  ;;  %v339_v26 = vsel %vm333_vm7, %v326_v10, 920167782  ;;  %v343_v27 = vsel %vm333_vm7, %v329_v13, 1326507024  ;;  %v419_v36 = vshrl.u32 %v1661_v46, %v418_v28 }
  0x66   : > { %v337_v29 = vsel %vm331_vm5, %v334_v20, %v336_v25  ;;  %v340_v30 = vsel %vm332_vm6, %v323_v9, %v339_v26  ;;  %v344_v31 = vsel %vm332_vm6, %v326_v10, %v343_v27  ;;  %v421_v44 = vshrl.u32 %v1662_v48, %v418_v28 }
  0x67   : > { %v341_v33 = vsel %vm331_vm5, %v338_v22, %v340_v30  ;;  %v345_v34 = vsel %vm331_vm5, %v342_v24, %v344_v31  ;;  %v353_v35 = vmul.u32 %v1916_v41, %v337_v29  ;;  %v424_v38 = vshrl.u32 %v1663_v50, %v418_v28 }
  0x68   : > { %v1955_v37 = vmul.u32.u64.low %v1916_v41, %v345_v34  ;;  %v1956_v39 = vmul.u32.u64.high %v1916_v41, %v345_v34, %v1955_v37  ;;  %v1959_v40 = vmul.u32.u64.low %v1916_v41, %v341_v33  ;;  %v1960_v42 = vmul.u32.u64.high %v1916_v41, %v341_v33, %v1959_v40 }
  0x69   : > { %v426_v47 = vshll.u32 %v1663_v50, %v417_v19  ;;  %v427_v49 = vshrl.u32 %v1664_v52, %v418_v28  ;;  %v429_v51 = vshll.u32 %v1664_v52, %v417_v19  ;;  %v430_v53 = vshrl.u32 %v1665_v54, %v418_v28 }
  0x6a   : > { %v432_v55 = vshll.u32 %v1665_v54, %v417_v19  ;;  %v422_v57 = vor.u32 %v421_v44, %v420_v32  ;;  %v425_v41 = vor.u32 %v424_v38, %v423_v45  ;;  %v433_v58 = vshrl.u32 %v1666_v63, %v418_v28 }
  0x6b   : > { %vm435_vm8 = vcmp.lt.s32.totalorder %v416_v15, 1  ;;  %vm355_vm9 = vc.u32 %v1956_v39, %v1959_v40  ;;  %v356_v59 = vadd.s32 1, %v1960_v42  ;;  %v428_v60 = vor.u32 %v427_v49, %v426_v47 }
  0x6c   : > { %v431_v61 = vor.u32 %v430_v53, %v429_v51  ;;  %v434_v62 = vor.u32 %v433_v58, %v432_v55  ;;  %vm436_vm11 = vcmp.lt.s32.totalorder %v416_v15, 2  ;;  %vm437_vm12 = vcmp.lt.s32.totalorder %v416_v15, 3 }
  0x6d   : > { %v357_v3 = vsel %vm355_vm9, %v356_v59, %v1960_v42  ;;  %vm438_vm13 = vcmp.lt.s32.totalorder %v416_v15, 4  ;;  %v439_v5 = vsel %vm435_vm8, %v419_v36, %v422_v57  ;;  %v443_v7 = vsel %vm435_vm8, %v422_v57, %v425_v41 }
  0x6e   : > { %v358_v9 = vadd.s32 %v357_v3, %v353_v35  ;;  %v440_v10 = vsel %vm438_vm13, %v428_v60, 2102212464  ;;  %v444_v13 = vsel %vm438_vm13, %v431_v61, 920167782  ;;  %v447_v19 = vsel %vm435_vm8, %v425_v41, %v428_v60 }
  0x6f   : > { %v441_v20 = vsel %vm437_vm12, %v425_v41, %v440_v10  ;;  %v445_v21 = vsel %vm437_vm12, %v428_v60, %v444_v13  ;;  %v448_v22 = vsel %vm438_vm13, %v434_v62, 1326507024  ;;  %v520_v27 = vsel %vm519_vm10, %v1928_v56, 0 }
  0x70   : > { %v359_v24 = vadd.s32 536870912, %v358_v9  ;;  %v446_v25 = vsel %vm436_vm11, %v443_v7, %v445_v21  ;;  %v449_v26 = vsel %vm437_vm12, %v431_v61, %v448_v22  ;;  %v442_v28 = vsel %vm436_vm11, %v439_v5, %v441_v20 }
  0x71   : > { %v450_v29 = vsel %vm436_vm11, %v447_v19, %v449_v26  ;;  %v1987_v30 = vmul.u32.u64.low %v1918_v43, %v446_v25  ;;  %v1988_v31 = vmul.u32.u64.high %v1918_v43, %v446_v25, %v1987_v30  ;;  %v508_v35 = vand.u32 2147483647, %v1880_v16 }
  0x72   : > { %v1991_v32 = vshrl.u32 %v359_v24, 30  ;;  %v1994_v33 = vmul.u32.u64.low %v1918_v43, %v450_v29  ;;  %v1995_v34 = vmul.u32.u64.high %v1918_v43, %v450_v29, %v1994_v33  ;;  %v522_v36 = vand.u32 31, %v520_v27 }
  0x73   : > { %v458_v37 = vmul.u32 %v1918_v43, %v442_v28  ;;  %v461_v15 = vadd.s32 1, %v1988_v31  ;;  %v515_v45 = vand.u32 8388607, %v508_v35  ;;  %v521_v57 = vshrl.u32 %v520_v27, 5 }
  0x74   : > { %v361_v56 = vshll.u32 %v1991_v32, 30  ;;  %v523_v42 = vsub.s32 32, %v522_v36  ;;  %vm460_vm14 = vc.u32 %v1995_v34, %v1987_v30  ;;  %v525_v47 = vshll.u32 %v1661_v46, %v522_v36 }
  0x75   : > { %v462_v38 = vsel %vm460_vm14, %v461_v15, %v1988_v31  ;;  %v528_v49 = vshll.u32 %v1662_v48, %v522_v36  ;;  %v531_v41 = vshll.u32 %v1663_v50, %v522_v36  ;;  %v534_v59 = vshll.u32 %v1664_v52, %v522_v36 }
  0x76   : > { %v362_v44 = vsub.s32 %v358_v9, %v361_v56  ;;  %v463_v53 = vadd.s32 %v462_v38, %v458_v37  ;;  %v526_v43 = vshrl.u32 %v1662_v48, %v523_v42  ;;  %v529_v55 = vshrl.u32 %v1663_v50, %v523_v42 }
  0x77   : > { %v532_v58 = vshrl.u32 %v1664_v52, %v523_v42  ;;  %v516_v62 = vor.u32 8388608, %v515_v45  ;;  %v535_v3 = vshrl.u32 %v1665_v54, %v523_v42  ;;  %v537_v5 = vshll.u32 %v1665_v54, %v522_v36 }
  0x78   : > { %v364_v51 = vsub.s32 0, %v362_v44  ;;  %v464_v61 = vadd.s32 536870912, %v463_v53  ;;  %v538_v7 = vshrl.u32 %v1666_v63, %v523_v42  ;;  %v527_v48 = vor.u32 %v526_v43, %v525_v47 }
  0x79   : > { %v530_v10 = vor.u32 %v529_v55, %v528_v49  ;;  %v533_v19 = vor.u32 %v532_v58, %v531_v41  ;;  %v536_v50 = vor.u32 %v535_v3, %v534_v59  ;;  %vm540_vm15 = vcmp.lt.s32.totalorder %v521_v57, 1 }
  0x7a   : > { %v1322_v60 = vmin.u32 %v364_v51, %v362_v44  ;;  %v2016_v13 = vshrl.u32 %v464_v61, 30  ;;  %vm542_vm2 = vcmp.lt.s32.totalorder %v521_v57, 3  ;;  %vm543_vm3 = vcmp.lt.s32.totalorder %v521_v57, 4 }
  0x7b   : > { %v556_v52 = vshll.u32 %v516_v62, 8  ;;  %v524_v22 = vshrl.u32 %v1661_v46, %v523_v42  ;;  %v539_v24 = vor.u32 %v538_v7, %v537_v5  ;;  %v549_v54 = vsel %vm543_vm3, %v536_v50, 920167782 }
  0x7c   : > { %v366_v9 = vclz %v1322_v60  ;;  %v466_v21 = vshll.u32 %v2016_v13, 30  ;;  %v354_v63 = vadd.s32 %v1959_v40, %v1956_v39  ;;  %vm541_vm5 = vcmp.lt.s32.totalorder %v521_v57, 2 }
  0x7d   : > { %v548_v25 = vsel %vm540_vm15, %v527_v48, %v530_v10  ;;  %v545_v28 = vsel %vm543_vm3, %v533_v19, 2102212464  ;;  %v550_v29 = vsel %vm542_vm2, %v533_v19, %v549_v54  ;;  %v552_v46 = vsel %vm540_vm15, %v530_v10, %v533_v19 }
  0x7e   : > { %v1323_v20 = vadd.s32 4294967294, %v366_v9  ;;  %v467_v27 = vsub.s32 %v463_v53, %v466_v21  ;;  %v544_v37 = vsel %vm540_vm15, %v524_v22, %v527_v48  ;;  %v553_v39 = vsel %vm543_vm3, %v539_v24, 1326507024 }
  0x7f   : > { %v546_v42 = vsel %vm542_vm2, %v530_v10, %v545_v28  ;;  %v554_v45 = vsel %vm542_vm2, %v536_v50, %v553_v39  ;;  %v551_v47 = vsel %vm541_vm5, %v548_v25, %v550_v29  ;;  %v459_v5 = vadd.s32 %v1987_v30, %v1995_v34 }
  0x80   : > { %vm1324_vm4 = vcmp.lt.s32.totalorder %v1323_v20, 0  ;;  %v469_v56 = vsub.s32 0, %v467_v27  ;;  %v555_v49 = vsel %vm541_vm5, %v552_v46, %v554_v45  ;;  %v547_v41 = vsel %vm541_vm5, %v544_v37, %v546_v42 }
  0x81   : > { %v369_v26 = vsel %vm1324_vm4, 0, %v1323_v20  ;;  %v2033_v53 = vmul.u32.u64.low %v556_v52, %v555_v49  ;;  %v2034_v43 = vmul.u32.u64.high %v556_v52, %v555_v49, %v2033_v53  ;;  %v563_v7 = vmul.u32 %v556_v52, %v547_v41 }
  0x82   : > { %v370_v31 = vsub.s32 32, %v369_v26  ;;  %v371_v33 = vshll.u32 %v362_v44, %v369_v26  ;;  %v374_v36 = vsub.s32 4294967266, %v369_v26  ;;  %v1326_v38 = vmin.u32 %v469_v56, %v467_v27 }
  0x83   : > { %v2037_v60 = vmul.u32.u64.low %v556_v52, %v551_v47  ;;  %v2038_v61 = vmul.u32.u64.high %v556_v52, %v551_v47, %v2037_v60  ;;  %v384_v57 = vsub.s32 4, %v1991_v32  ;;  %vm300_vm8 = vcmp.lt.s32.totalorder %v1864_v8, 0 }
  0x84   : > { %v372_v40 = vshrl.u32 %v354_v63, %v370_v31  ;;  %v375_v15 = vadd.s32 127, %v374_v36  ;;  %v471_v55 = vclz %v1326_v38  ;;  %vm2050_vm9 = vcmp.le.f32.partialorder %v298_v14, 0.7853982 }
  0x85   : > { %vm565_vm7 = vc.u32 %v2034_v43, %v2037_v60  ;;  %v566_v10 = vadd.s32 1, %v2038_v61  ;;  %v385_v63 = vsel %vm300_vm8, %v384_v57, %v1991_v32  ;;  %v489_v32 = vsub.s32 4, %v2016_v13 }
  0x86   : > { %v373_v44 = vor.u32 %v372_v40, %v371_v33  ;;  %v376_v51 = vshll.u32 %v375_v15, 23  ;;  %v1327_v62 = vadd.s32 4294967294, %v471_v55  ;;  %v387_v33 = vsel %vm2050_vm9, 0, %v385_v63 }
  0x87   : > { %v567_v52 = vsel %vm565_vm7, %v566_v10, %v2038_v61  ;;  %v391_v56 = vadd.s32 3, %v387_v33  ;;  %vm405_vm10 = vcmp.lt.s32.totalorder %v1870_v11, 0  ;;  %vm404_vm11 = vcmp.le.f32.partialorder %v403_v17, 0.7853982 }
  0x88   : > { %v377_v58 = vor.u32 4788187, %v376_v51  ;;  %v380_v59 = vcvt.s32.f32 %v373_v44  ;;  %vm1328_vm6 = vcmp.lt.s32.totalorder %v1327_v62, 0  ;;  %v568_v24 = vadd.s32 %v567_v52, %v563_v7 }
  0x89   : > { %v474_v48 = vsel %vm1328_vm6, 0, %v1327_v62  ;;  %v490_v42 = vsel %vm405_vm10, %v489_v32, %v2016_v13  ;;  %v392_v45 = vand.u32 3, %v391_v56  ;;  %v706_v49 = vand.u32 3, %v387_v33 }
  0x8a   : > { %v378_v3 = vand.u32 2147483647, %v377_v58  ;;  %v475_v19 = vsub.s32 32, %v474_v48  ;;  %v476_v50 = vshll.u32 %v467_v27, %v474_v48  ;;  %v479_v20 = vsub.s32 4294967266, %v474_v48 }
  0x8b   : > { %v569_v28 = vadd.s32 536870912, %v568_v24  ;;  %v492_v51 = vsel %vm404_vm11, 0, %v490_v42  ;;  %vm390_vm12 = vweird.f32 %v1864_v8  ;;  %vm397_vm13 = vcmp.eq.s32.totalorder %v392_v45, 2 }
  0x8c   : > { %v381_v9 = vmul.f32 %v380_v59, %v378_v3  ;;  %v477_v21 = vshrl.u32 %v459_v5, %v475_v19  ;;  %v480_v22 = vadd.s32 127, %v479_v20  ;;  %vm711_vm14 = vcmp.eq.s32.totalorder %v706_v49, 2 }
  0x8d   : > { %v2059_v31 = vshrl.u32 %v569_v28, 30  ;;  %vm393_vm15 = vcmp.lt.s32.totalorder %v392_v45, 2  ;;  %vm394_vm2 = vcmp.eq.s32.totalorder %v392_v45, 0  ;;  %v496_v58 = vadd.s32 3, %v492_v51 }
  0x8e   : > { %v382_v34 = vxor.u32 2147483648, %v381_v9  ;;  %v478_v26 = vor.u32 %v477_v21, %v476_v50  ;;  %v481_v27 = vshll.u32 %v480_v22, 23  ;;  %v564_v61 = vadd.s32 %v2037_v60, %v2034_v43 }
  0x8f   : > { %v571_v46 = vshll.u32 %v2059_v31, 30  ;;  %vm708_vm4 = vcmp.eq.s32.totalorder %v706_v49, 0  ;;  %vm707_vm5 = vcmp.lt.s32.totalorder %v706_v49, 2  ;;  %v497_v43 = vand.u32 3, %v496_v58 }
  0x90   : > { %v383_v54 = vsel %vm300_vm8, %v382_v34, %v381_v9  ;;  %v482_v14 = vor.u32 4788187, %v481_v27  ;;  %v485_v29 = vcvt.s32.f32 %v478_v26  ;;  %v810_v52 = vand.u32 3, %v492_v51 }
  0x91   : > { %v386_v25 = vsel %vm2050_vm9, %v1864_v8, %v383_v54  ;;  %v572_v39 = vsub.s32 %v568_v24, %v571_v46  ;;  %vm502_vm6 = vcmp.eq.s32.totalorder %v497_v43, 2  ;;  %vm499_vm8 = vcmp.eq.s32.totalorder %v497_v43, 0 }
  0x92   : > { %1530 = vcosq.f32 %v386_v25  ;;  %v483_v36 = vand.u32 2147483647, %v482_v14  ;;  %vm815_vm7 = vcmp.eq.s32.totalorder %v810_v52, 2  ;;  %vm812_vm9 = vcmp.eq.s32.totalorder %v810_v52, 0 }
  0x93   : > { %1532 = vsinq.f32 %v386_v25  ;;  %v574_v15 = vsub.s32 0, %v572_v39 }
  0x94   : > { %v486_v37 = vmul.f32 %v485_v29, %v483_v36  ;;  %v594_v36 = vsub.s32 4, %v2059_v31 }
  0x95   : > { %v1330_v47 = vmin.u32 %v574_v15, %v572_v39 }
  0x96   : > { %v487_v40 = vxor.u32 2147483648, %v486_v37 }
  0x97   : > { %v576_v53 = vclz %v1330_v47 }
  0x98   : > { %v488_v38 = vsel %vm405_vm10, %v487_v40, %v486_v37  ;;  %vm498_vm10 = vcmp.lt.s32.totalorder %v497_v43, 2 }
  0x99   : > { %v491_v44 = vsel %vm404_vm11, %v1870_v11, %v488_v38  ;;  %v1331_v41 = vadd.s32 4294967294, %v576_v53  ;;  %vm811_vm11 = vcmp.lt.s32.totalorder %v810_v52, 2 }
  0x9a   : > { %1534 = vcosq.f32 %v491_v44 }
  0x9b   : > { %1536 = vsinq.f32 %v491_v44  ;;  %vm1332_vm3 = vcmp.lt.s32.totalorder %v1331_v41, 0 }
  0x9c   : > { %v579_v3 = vsel %vm1332_vm3, 0, %v1331_v41 }
  0x9d   : > { %v580_v9 = vsub.s32 32, %v579_v3  ;;  %v581_v57 = vshll.u32 %v572_v39, %v579_v3  ;;  %v584_v48 = vsub.s32 4294967266, %v579_v3  ;;  %v926_v3 = vld [vmem:[%s2192_s3 + $0x8] sm:$0xff] }
  0x9f   : > { %v1531_v55 = vpop.eup %1530  ;;  %v582_v20 = vshrl.u32 %v564_v61, %v580_v9  ;;  %v585_v30 = vadd.s32 127, %v584_v48  ;;  %v931_v9 = vld [vmem:[%s2192_s3 + $0x30] sm:$0xff] }
  0xa0   : > { %v1533_v17 = vpop.eup %1532  ;;  %v398_v13 = vxor.u32 2147483648, %v1531_v55 }
  0xa1   : > { %v395_v59 = vxor.u32 2147483648, %v1533_v17  ;;  %v583_v21 = vor.u32 %v582_v20, %v581_v57  ;;  %v586_v22 = vshll.u32 %v585_v30, 23 }
  0xa2   : > { %v399_v62 = vsel %vm397_vm13, %v398_v13, %v1533_v17  ;;  %v713_v5 = vsel %vm711_vm14, %v398_v13, %v1533_v17  ;;  %vm495_vm13 = vweird.f32 %v1870_v11  ;;  %vm509_vm14 = vcmp.le.f32.partialorder %v508_v35, 0.7853982 }
  0xa3   : > { %v396_v7 = vsel %vm394_vm2, %v1531_v55, %v395_v59  ;;  %v710_v19 = vsel %vm708_vm4, %v1531_v55, %v395_v59  ;;  %v587_v24 = vor.u32 4788187, %v586_v22  ;;  %v590_v54 = vcvt.s32.f32 %v583_v21 }
  0xa4   : > { %v400_v10 = vsel %vm393_vm15, %v396_v7, %v399_v62  ;;  %v714_v34 = vsel %vm707_vm5, %v710_v19, %v713_v5  ;;  %v928_v5 = vld [vmem:[%s2192_s3 + $0x18] sm:$0xff]  ;;  %v929_v7 = vld [vmem:[%s2192_s3 + $0x20] sm:$0xff] }
  0xa5   : > { %v401_v50 = vsel %vm390_vm12, nan, %v400_v10  ;;  %v715_v60 = vsel %vm390_vm12, nan, %v714_v34  ;;  %v588_v27 = vand.u32 2147483647, %v587_v24  ;;  %vm510_vm12 = vcmp.lt.s32.totalorder %v1880_v16, 0 }
  0xa6   : > { %402 = vst [vmem:[#allocation2 + $0x2] sm:$0x1] %v401_v50  ;;  %716 = vst [vmem:[#allocation2 + $0x5] sm:$0x1] %v715_v60  ;;  %v595_v11 = vsel %vm510_vm12, %v594_v36, %v2059_v31 }
  0xa7   : > { %v1535_v63 = vpop.eup %1534  ;;  %v591_v14 = vmul.f32 %v590_v54, %v588_v27  ;;  %v597_v45 = vsel %vm509_vm14, 0, %v595_v11 }
  0xa8   : > { %v1537_v25 = vpop.eup %1536  ;;  %v503_v26 = vxor.u32 2147483648, %v1535_v63  ;;  %v601_v38 = vadd.s32 3, %v597_v45  ;;  %v914_v49 = vand.u32 3, %v597_v45 }
  0xa9   : > { %v500_v28 = vxor.u32 2147483648, %v1537_v25  ;;  %v592_v56 = vxor.u32 2147483648, %v591_v14 }
  0xaa   : > { %v504_v8 = vsel %vm502_vm6, %v503_v26, %v1537_v25  ;;  %v817_v29 = vsel %vm815_vm7, %v503_v26, %v1537_v25  ;;  %v602_v47 = vand.u32 3, %v601_v38  ;;  %vm919_vm2 = vcmp.eq.s32.totalorder %v914_v49, 2 }
  0xab   : > { %v501_v33 = vsel %vm499_vm8, %v1535_v63, %v500_v28  ;;  %v814_v46 = vsel %vm812_vm9, %v1535_v63, %v500_v28  ;;  %v593_v15 = vsel %vm510_vm12, %v592_v56, %v591_v14  ;;  %vm916_vm4 = vcmp.eq.s32.totalorder %v914_v49, 0 }
  0xac   : > { %v505_v32 = vsel %vm498_vm10, %v501_v33, %v504_v8  ;;  %v818_v37 = vsel %vm811_vm11, %v814_v46, %v817_v29  ;;  %v596_v42 = vsel %vm509_vm14, %v1880_v16, %v593_v15  ;;  %vm607_vm15 = vcmp.eq.s32.totalorder %v602_v47, 2 }
  0xad   : > { %v506_v39 = vsel %vm495_vm13, nan, %v505_v32  ;;  %v819_v40 = vsel %vm495_vm13, nan, %v818_v37  ;;  %1538 = vcosq.f32 %v596_v42  ;;  %vm604_vm3 = vcmp.eq.s32.totalorder %v602_v47, 0 }
  0xae   : > { %507 = vst [vmem:[#allocation2 + $0x3] sm:$0x1] %v506_v39  ;;  %820 = vst [vmem:[#allocation2 + $0x6] sm:$0x1] %v819_v40  ;;  %1540 = vsinq.f32 %v596_v42  ;;  %vm603_vm5 = vcmp.lt.s32.totalorder %v602_v47, 2  ;;  %vm915_vm6 = vcmp.lt.s32.totalorder %v914_v49, 2  ;;  %vm600_vm7 = vweird.f32 %v1880_v16 }
  0xaf   : > { %v927_v16 = vld [vmem:[%s2192_s3 + $0x10] sm:$0xff] }
  0xba   : > { %v1539_v44 = vpop.eup %1538 }
  0xbb   : > { %v1541_v35 = vpop.eup %1540  ;;  %v608_v51 = vxor.u32 2147483648, %v1539_v44 }
  0xbc   : > { %v605_v53 = vxor.u32 2147483648, %v1541_v35 }
  0xbd   : > { %v609_v31 = vsel %vm607_vm15, %v608_v51, %v1541_v35  ;;  %v921_v55 = vsel %vm919_vm2, %v608_v51, %v1541_v35 }
  0xbe   : > { %v606_v41 = vsel %vm604_vm3, %v1539_v44, %v605_v53  ;;  %v918_v17 = vsel %vm916_vm4, %v1539_v44, %v605_v53 }
  0xbf   : > { %v610_v13 = vsel %vm603_vm5, %v606_v41, %v609_v31  ;;  %v922_v58 = vsel %vm915_vm6, %v918_v17, %v921_v55 }
  0xc0   : > { %v611_v59 = vsel %vm600_vm7, nan, %v610_v13  ;;  %v923_v61 = vsel %vm600_vm7, nan, %v922_v58 }
  0xc1   : > { %612 = vst [vmem:[#allocation2 + $0x4] sm:$0x1] %v611_v59  ;;  %924 = vst [vmem:[#allocation2 + $0x7] sm:$0x1] %v923_v61 }
  0xc8   : > { %v933_v62 = vld [vmem:[#allocation2] sm:$0xff] }
  0xc9   : > { %1390 = vmatprep.subr.mxu0 %v933_v62 }
  0xca   : > { %1391 = vmatpush3.msra.mxu0 %v933_v62 }
  0xcb   : > { %1393 = vmatmul.mubr.msk.f32.vlgmr.msra.gmra.mxu0 %vm934_vm0, %v926_v3  ;;  %1404 = vmatprep.subr.mxu0 %v1838_v0 }
  0xcc   : > { %1405 = vmatpush3.msra.mxu0 %v1838_v0  ;;  %1395 = vmatprep.mubr.msk.f32.mxu0 %vm934_vm0, %v927_v16  ;;  %v930_v0 = vld [vmem:[%s2192_s3 + $0x28] sm:$0xff] }
  0xcd   : > { %1406 = vmatprep.subr.mxu0 %v1841_v1 }
  0xce   : > { %1407 = vmatpush3.msra.mxu0 %v1841_v1  ;;  %v932_v1 = vld [vmem:[%s2192_s3 + $0x38] sm:$0xff] }
  0xcf   : > { %1396 = vmatmul.mubr.msk.f32.gmra.mxu0 %vm934_vm0, %v928_v5  ;;  %1408 = vmatprep.subr.mxu0 %v1847_v2 }
  0xd0   : > { %1409 = vmatpush3.msra.mxu0 %v1847_v2  ;;  %1398 = vmatprep.mubr.msk.f32.mxu0 %vm934_vm0, %v929_v7  ;;  %v271_v2 = vld [vmem:[%s2191_s2] sm:$0xff] }
  0xd1   : > { %1410 = vmatprep.subr.mxu0 %v1853_v4 }
  0xd2   : > { %1411 = vmatpush3.msra.mxu0 %v1853_v4  ;;  %v272_v4 = vld [vmem:[%s2191_s2 + $0x8] sm:$0xff] }
  0xd3   : > { %1399 = vmatmul.mubr.msk.f32.gmra.mxu0 %vm934_vm0, %v930_v0  ;;  %1412 = vmatprep.subr.mxu0 %v1861_v6 }
  0xd4   : > { %1413 = vmatpush3.msra.mxu0 %v1861_v6  ;;  %1401 = vmatprep.mubr.msk.f32.mxu0 %vm934_vm0, %v931_v9 }
  0xd5   : > { %1414 = vmatprep.subr.mxu0 %v1873_v12 }
  0xd6   : > { %1415 = vmatpush3.msra.mxu0 %v1873_v12 }
  0xd7   : > { %1402 = vmatmul.mubr.msk.f32.gmra.mxu0 %vm934_vm0, %v932_v1  ;;  %1416 = vmatprep.subr.mxu0 %v1884_v18 }
  0xd8   : > { %1417 = vmatpush3.msra.mxu0 %v1884_v18  ;;  %1420 = vmatprep.mubr.msk.f32.mxu0 %vm1064_vm1, %v271_v2 }
  0xd9   : > { %1418 = vmatprep.subr.mxu0 %v1894_v23 }
  0xda   : > { %1419 = vmatpush3.msra.mxu0 %v1894_v23 }
  0xdb   : > { %1421 = vmatmul.mubr.msk.f32.vlgmr.msra.gmra.mxu0 %vm1064_vm1, %v272_v4 }
 0x11a   : > { %v1425_v6 = vpop.f32.mrf.mxu1 }
 0x11c   : > { %v1165_v12 = vpop.f32.mrf.mxu1 }
 0x11e   : > { %v1428_v48 = vpop.f32.mrf.mxu1 }
 0x120   : > { %v1175_v50 = vpop.f32.mrf.mxu1 }
 0x122   : > { %v1431_v43 = vpop.f32.mrf.mxu1 }
 0x124   : > { %v1185_v22 = vpop.f32.mrf.mxu1 }
 0x18b   : > { %v1394_v57 = vpop.f32.mrf.mxu0 }
 0x18d   : > { %v1025_v10 = vpop.f32.mrf.mxu0 }
 0x18f   : > { %v1397_v19 = vpop.f32.mrf.mxu0 }
 0x190   : > { %v1171_v18 = vadd.f32 %v1425_v6, %v1397_v19 }
 0x191   : > { %v1035_v20 = vpop.f32.mrf.mxu0 }
 0x192   : > { %1197 = vst [vmem:[%s266_s11 + $0x18] sm:$0xff] %v1171_v18  ;;  %v1166_v30 = vadd.f32 %v1165_v12, %v1035_v20 }
 0x193   : > { %v1400_v34 = vpop.f32.mrf.mxu0 }
 0x194   : > { %1196 = vst [vmem:[%s266_s11 + $0x10] sm:$0xff] %v1166_v30  ;;  %v1181_v23 = vadd.f32 %v1428_v48, %v1400_v34 }
 0x195   : > { %v1045_v60 = vpop.f32.mrf.mxu0 }
 0x196   : > { %1199 = vst [vmem:[%s266_s11 + $0x28] sm:$0xff] %v1181_v23  ;;  %v1176_v52 = vadd.f32 %v1175_v50, %v1045_v60 }
 0x197   : > { %v1403_v21 = vpop.f32.mrf.mxu0 }
 0x198   : > { %1198 = vst [vmem:[%s266_s11 + $0x20] sm:$0xff] %v1176_v52  ;;  %v1191_v24 = vadd.f32 %v1431_v43, %v1403_v21 }
 0x199   : > { %v1055_v54 = vpop.f32.mrf.mxu0 }
 0x19a   : > { %1201 = vst [vmem:[%s266_s11 + $0x38] sm:$0xff] %v1191_v24  ;;  %v1186_v63 = vadd.f32 %v1185_v22, %v1055_v54 }
 0x19b   : > { %v1422_v25 = vpop.f32.mrf.mxu0 }
 0x19c   : > { %1200 = vst [vmem:[%s266_s11 + $0x30] sm:$0xff] %v1186_v63  ;;  %v1161_v26 = vadd.f32 %v1422_v25, %v1394_v57 }
 0x19d   : > { %v1155_v27 = vpop.f32.mrf.mxu0 }
 0x19e   : > { %1195 = vst [vmem:[%s266_s11 + $0x8] sm:$0xff] %v1161_v26  ;;  %v1156_v28 = vadd.f32 %v1155_v27, %v1025_v10 }
 0x1a0   : > { %1194 = vst [vmem:[%s266_s11] sm:$0xff] %v1156_v28 }
 0x1a1   : > { %1598 = shalt.err (!%p1595_p4)
}
 0x1a2   : > { %s1599_s23 = scalar_lea.hbm %s2146_s7, 1024  ;;  %s1603_s15 = scalar_lea.hbm %s2194_s5, 2048 }
 0x1a3   : > { %p1600_p11 = scmp.ne.s32.totalorder %s2146_s7, %s1599_s23  ;;  %p1604_p13 = scmp.lt.s32.totalorder %s2146_s7, %s2194_s5 }
 0x1a4   : > { %p1605_p3 = scmp.lt.s32.totalorder %s1603_s15, %s1599_s23 }
 0x1a5   : > { %p1601_p5 = pnand %p1600_p11, %p2212_p2 }
 0x1a6   : > { %p1606_p12 = por %p1605_p3, %p1604_p13 }
 0x1a7   : > { %p1602_p6 = pneg %p1601_p5 }
 0x1a9   : > { %p1607_p0 = pnand %p1606_p12, %p1602_p6 }
 0x1ab   : > { %1610 = shalt.err (!%p1607_p0)
}
 0x1ac   : > { %s1668_s16 = smov 128   ;;  %s1669_s12 = smov 256  }
 0x1ad   : > { %s1670_s29 = smov 8  }
 0x1ae   : > { %1466 = dma.vmem_to_hbm [thread:$0]  (%p2212_p2), %s2141_s17, 1024, %s2146_s7, %s1203_s13, %s1668_s16, %s1669_s12, %s1670_s29  }
 0x1af PF: > { %s1230_s25 = sand.u32 1, %s1641_s18   ;;  %p2213_p7 = scmp.ne.s32.totalorder %s2202_s6, 0 }
 0x1b0   : > { %p2214_p8 = scmp.ge.s32.totalorder %s1653_s21, 2  ;;  %s1231_s22 = scalar_lea.sflag [#allocation5], %s1230_s25 }
 0x1b2   : > { %p1477_p9 = pnand %p2214_p8, %p2213_p7 }
 0x1b4   : > { %p1478_p10 = pneg %p1477_p9 }
 0x1b6   : > { %1636 = dma.done.wait (%p1478_p10), %s1231_s22, 1024  }
 0x1b7   : > { %1638 = vsyncadd (%p1478_p10), %s1231_s22, 4294966272  ;;  %p19_p1 = scmp.ge.s32.totalorder %s1726_s24, 4   ;;  %s2215_s18 = smov %s1645_s19 }
 0x1b8   : > { %s2216_s19 = smov %s1649_s20  ;;  %s2217_s20 = smov %s1738_s27 }
 0x1b9   : > { %s2218_s21 = smov %s1726_s24  ;;  %21 = sbr.rel (!%p19_p1) target bundleno = 6 (0x6), region = 93 }
 0x1be   :  { %1236 = vsyncpa [#allocation4], 1 }
 0x1bf   :  { %1238 = vsyncpa [#allocation4 + $0x1], 1 }
 0x1c0   :  { %1239 = vsyncpa [#allocation5], 1 }
 0x1c1   :  { %1241 = vsyncpa [#allocation5 + $0x1], 1 }
 0x1c2   :  { %1242 = vsyncpa [#allocation6], 1 }
 0x1c3   :  { %1244 = vsyncpa [#allocation6 + $0x1], 1 }

</bundles_post_ra>
